<compile_context>
chip_gen: v7x
topology: tpu7x:2x2x1
jax: 0.10.0
libtpu: 0.0.40
codegen_flags: <defaults>
</compile_context>

<pallas_src>
import functools
import math

import jax
import jax.numpy as jnp
from jax.experimental import pallas as pl
from jax.experimental.pallas import tpu as pltpu


def _round_up(x, m):
    return ((x + m - 1) // m) * m


# ----------------------------------------------------------------------------
# Pallas kernel: lane-dense implicit-GEMM direct convolution.
# One grid step = one (batch, flat-output-tile).
# ----------------------------------------------------------------------------
def _rot_dcf_conv_kernel(w_ref, x_ref, b_ref, o_ref, *, k, stride, wp, tile):
    # w_ref: (k*k, Cout, Cin)   bf16  grid-invariant (fetched once)
    # x_ref: (1, 1, Cin, W_in)  bf16  input window of this (batch, tile)
    # b_ref: (Cout, 1)          f32   grid-invariant
    # o_ref: (1, Cout, tile)    f32   lane-dense pre-output tile
    cout = o_ref.shape[1]
    acc = jnp.zeros((cout, tile), jnp.float32)
    for kh in range(k):                          # k*k is small -> static unroll
        for kw in range(k):
            d = kh * wp + kw                     # flat tap offset (static)
            if stride == 1:
                xs = x_ref[0, 0, :, pl.ds(d, tile)]                # (Cin, tile)
            else:
                xs = x_ref[0, 0, :, pl.ds(d, tile, stride=stride)]
            acc += jnp.dot(w_ref[kh * k + kw], xs,                 # (Cout, tile)
                           preferred_element_type=jnp.float32)
    o_ref[0] = (acc + b_ref[...]).astype(o_ref.dtype)


def pallas_rot_conv2d(x, weight, bias_full, stride, padding, *, max_tile=512):
    """x: (B, Cin, H, W) f32; weight: (Cout, Cin, k, k) f32; bias_full: (Cout,)."""
    B, Cin, H, W = x.shape
    Cout, _, k, _ = weight.shape
    p, s = padding, stride
    Ho = (H + 2 * p - k) // s + 1
    Wo = (W + 2 * p - k) // s + 1
    Hp, Wp = H + 2 * p, W + 2 * p

    # ---- tiling of the flattened pre-output axis ---------------------------
    # Pre-output column m = h*Wp + w (h < Ho, w < Wp); tap (kh, kw) of column m
    # reads padded-input flat index s*m + kh*Wp + kw.  Columns with w >= Wo are
    # junk and get sliced off after the kernel.
    N = Ho * Wp
    n128 = _round_up(N, 128)
    if n128 <= max_tile:
        tile, n_tiles = n128, 1
    else:
        n_tiles = pl.cdiv(n128, max_tile)
        tile = _round_up(pl.cdiv(n128, n_tiles), 128)
    N_pad = tile * n_tiles

    d_max = (k - 1) * (Wp + 1)                   # largest flat tap offset
    w_need = (tile - 1) * s + d_max + 1          # input span one tile touches
    W_in = _round_up(w_need, 128)
    total = (n_tiles - 1) * tile * s + W_in      # >= Hp*Wp by construction

    # ---- layout prep (cheap, fused XLA) ------------------------------------
    x_pad = jnp.pad(x, ((0, 0), (0, 0), (p, p), (p, p)))
    x_flat = x_pad.reshape(B, Cin, Hp * Wp).astype(jnp.bfloat16)
    x_flat = jnp.pad(x_flat, ((0, 0), (0, 0), (0, total - Hp * Wp)))
    if n_tiles == 1:
        x_win = x_flat[:, None]                  # (B, 1, Cin, W_in), no copy
    else:                                        # overlapping per-tile windows
        x_win = jnp.stack(
            [jax.lax.slice_in_dim(x_flat, t * tile * s, t * tile * s + W_in,
                                  axis=2)
             for t in range(n_tiles)], axis=1)   # (B, n_tiles, Cin, W_in)

    # Weight -> (k*k, Cout, Cin): w[kh*k+kw] is the (Cout, Cin) tap matrix.
    w_kk = jnp.transpose(weight, (2, 3, 0, 1)).reshape(k * k, Cout, Cin)
    w_kk = w_kk.astype(jnp.bfloat16)
    b2d = bias_full.astype(jnp.float32).reshape(Cout, 1)

    kernel = functools.partial(_rot_dcf_conv_kernel,
                               k=k, stride=s, wp=Wp, tile=tile)

    flops = 2 * B * Cout * Cin * k * k * N_pad
    bytes_accessed = (x_win.size * x_win.dtype.itemsize
                      + w_kk.size * w_kk.dtype.itemsize
                      + b2d.size * b2d.dtype.itemsize
                      + B * Cout * N_pad * 4)

    y_pre = pl.pallas_call(
        kernel,
        out_shape=jax.ShapeDtypeStruct((B, Cout, N_pad), jnp.float32),
        grid_spec=pltpu.PrefetchScalarGridSpec(
            num_scalar_prefetch=0,
            grid=(B, n_tiles),
            in_specs=[
                # grid-invariant weight / bias: constant index_map => one DMA.
                pl.BlockSpec((k * k, Cout, Cin), lambda b, t: (0, 0, 0)),
                # per-(batch, tile) input window.
                pl.BlockSpec((1, 1, Cin, W_in), lambda b, t: (b, t, 0, 0)),
                pl.BlockSpec((Cout, 1), lambda b, t: (0, 0)),
            ],
            out_specs=pl.BlockSpec((1, Cout, tile), lambda b, t: (b, 0, t)),
        ),
        compiler_params=pltpu.CompilerParams(
            dimension_semantics=("parallel", "parallel")),
        cost_estimate=pl.CostEstimate(
            flops=flops, transcendentals=0, bytes_accessed=bytes_accessed),
    )(w_kk, x_win, b2d)

    # Drop junk columns: keep m = h*Wp + w with w < Wo.
    y = y_pre[:, :, :Ho * Wp].reshape(B, Cout, Ho, Wp)[:, :, :, :Wo]
    return y.astype(x.dtype)                     # (B, Cout, Ho, Wo)


# ----------------------------------------------------------------------------
# Glue: rotation_weight (exact port of the PyTorch method, tiny matmuls)
# ----------------------------------------------------------------------------
def rotation_weight(joint_coeff, s_bases, rot_mtx_s, r_bases, rot_mtx_r,
                    k_s, Ntheta, K, K_a, O, I):
    s_b = s_bases.reshape(-1, K)                   # (k_s*k_s, K)
    jcoeff = joint_coeff.reshape(K, -1)            # (K, O*I*K_a)
    rot_kernel = []
    for i in range(Ntheta):
        rj = rot_mtx_s[i].T @ jcoeff                               # (K, O*I*K_a)
        rj = rj.reshape(K, O, I, K_a).transpose(3, 0, 1, 2)        # (K_a, K, O, I)
        rj = rj.reshape(K_a, -1)
        rj = rot_mtx_r[i] @ rj                                     # (K_a, K*O*I)
        rj = rj.reshape(K_a, K, O, I).transpose(1, 2, 3, 0)        # (K, O, I, K_a)
        rec = s_b @ rj.reshape(K, -1)                              # (k2, O*I*K_a)
        rec = rec.reshape(-1, K_a) @ r_bases                       # (k2*O*I, Ntheta)
        rec = rec.reshape(k_s, k_s, O, I, Ntheta).transpose(2, 4, 3, 0, 1)
        rec = rec.reshape(O, Ntheta * I, k_s, k_s)
        rot_kernel.append(rec)
    rk = jnp.stack(rot_kernel, axis=0)             # (Ntheta, O, Ntheta*I, k, k)
    return rk.reshape(Ntheta * O, Ntheta * I, k_s, k_s)


def rot_dcf_forward(x, params, cfg):
    rk = rotation_weight(params["joint_coeff"], params["s_bases"],
                         params["rot_mtx_s"], params["r_bases"],
                         params["rot_mtx_r"], cfg["kernel_size"],
                         cfg["Ntheta"], cfg["K"], cfg["K_a"],
                         cfg["out_channels"], cfg["in_channels"])
    if params.get("bias") is not None:
        bias_full = jnp.tile(params["bias"], cfg["Ntheta"])  # torch .repeat(Ntheta)
    else:
        bias_full = jnp.zeros((cfg["Ntheta"] * cfg["out_channels"],), jnp.float32)
    out = pallas_rot_conv2d(x, rk, bias_full, cfg["stride"], cfg["padding"])
    return out, rk, bias_full


# ----------------------------------------------------------------------------
if __name__ == "__main__":
    out_channels, in_channels, kernel_size = 4, 2, 3
    Ntheta, K, K_a = 4, 5, 3
    stride = 1
    padding = (kernel_size - 1) // 2
    B, H, W = 2, 16, 16
    Cin = Ntheta * in_channels   # conv input channels implied by the kernel shape

    cfg = dict(out_channels=out_channels, in_channels=in_channels,
               kernel_size=kernel_size, Ntheta=Ntheta, K=K, K_a=K_a,
               stride=stride, padding=padding)

    key = jax.random.PRNGKey(0)
    ks = jax.random.split(key, 7)

    # TODO(synk): initialize_bases('FB_FOUR', ...) (analytic Fourier-Bessel
    # bases) is not provided; use deterministic synthetic buffers of the
    # identical shapes the module registers.
    s_bases = jax.random.normal(ks[0], (kernel_size, kernel_size, K), jnp.float32)
    rot_mtx_s = jax.random.normal(ks[1], (Ntheta, K, K), jnp.float32)
    r_bases = jax.random.normal(ks[2], (K_a, Ntheta), jnp.float32)
    rot_mtx_r = jax.random.normal(ks[3], (Ntheta, K_a, K_a), jnp.float32)

    stdv = 1.0 / math.sqrt(K * in_channels * K_a)
    joint_coeff = stdv * jax.random.normal(
        ks[4], (K, out_channels, in_channels, K_a), jnp.float32)
    bias = (1.0 / math.sqrt(out_channels)) * jax.random.normal(
        ks[5], (out_channels,), jnp.float32)

    params = dict(s_bases=s_bases, rot_mtx_s=rot_mtx_s, r_bases=r_bases,
                  rot_mtx_r=rot_mtx_r, joint_coeff=joint_coeff, bias=bias)

    x = jax.random.normal(ks[6], (B, Cin, H, W), jnp.float32)

    out, rot_kernel, bias_full = rot_dcf_forward(x, params, cfg)
    out = jax.block_until_ready(out)

    # Pure-JAX reference (F.conv2d equivalent) for a sanity check.
    ref = jax.lax.conv_general_dilated(
        x, rot_kernel, window_strides=(stride, stride),
        padding=((padding, padding), (padding, padding)),
        dimension_numbers=("NCHW", "OIHW", "NCHW"))
    ref = ref + bias_full[None, :, None, None]

    max_abs = float(jnp.max(jnp.abs(ref)))
    err = float(jnp.max(jnp.abs(out - ref)))
    assert out.shape == (B, Ntheta * out_channels, H, W), out.shape
    assert err <= 2e-2 * max_abs + 1e-5, (err, max_abs)

    print("KERNEL_OK")
</pallas_src>

<mosaic_0001>
module attributes {stable_mosaic.version = 11 : i64} {
  func.func @_rot_dcf_conv_kernel(%arg0: i32, %arg1: i32, %arg2: memref<9x16x8xbf16, #tpu.memory_space<vmem>>, %arg3: memref<1x1x8x512xbf16, #tpu.memory_space<vmem>>, %arg4: memref<16x1xf32, #tpu.memory_space<vmem>>, %arg5: memref<1x16x384xf32, #tpu.memory_space<vmem>>) attributes {dimension_semantics = [#tpu.dimension_semantics<parallel>, #tpu.dimension_semantics<parallel>], iteration_bounds = array<i64: 2, 1>, scalar_prefetch = 0 : i64, scratch_operands = 0 : i64, tpu.core_type = #tpu.core_type<tc>, window_params = [{pipeline_mode = #tpu.pipeline_mode<synchronous>, transform_indices = @transform_0, window_bounds = array<i64: 9, 16, 8>}, {transform_indices = @transform_1, window_bounds = array<i64: 1, 1, 8, 512>}, {pipeline_mode = #tpu.pipeline_mode<synchronous>, transform_indices = @transform_2, window_bounds = array<i64: 16, 1>}, {transform_indices = @transform_3, window_bounds = array<i64: 1, 16, 384>}]} {
    %cst = arith.constant 0.000000e+00 : f32
    %0 = vector.broadcast %cst : f32 to vector<16x384xf32>
    %c0 = arith.constant 0 : index
    %c0_0 = arith.constant 0 : index
    %c0_1 = arith.constant 0 : index
    %c0_2 = arith.constant 0 : index
    %1 = vector.load %arg3[%c0, %c0_0, %c0_1, %c0_2] : memref<1x1x8x512xbf16, #tpu.memory_space<vmem>>, vector<1x1x8x384xbf16>
    %2 = vector.shape_cast %1 : vector<1x1x8x384xbf16> to vector<8x384xbf16>
    %c0_3 = arith.constant 0 : index
    %c0_4 = arith.constant 0 : index
    %c0_5 = arith.constant 0 : index
    %3 = vector.load %arg2[%c0_3, %c0_4, %c0_5] : memref<9x16x8xbf16, #tpu.memory_space<vmem>>, vector<1x16x8xbf16>
    %4 = vector.shape_cast %3 : vector<1x16x8xbf16> to vector<16x8xbf16>
    %cst_6 = arith.constant dense<0.000000e+00> : vector<16x384xf32>
    %5 = tpu.matmul %4, %2, %cst_6 {dimension_numbers = #tpu.dot_dimension_numbers<[1], [0], [0], [1], [0, 0, 1, 1], [], []>} : vector<16x8xbf16>, vector<8x384xbf16>, vector<16x384xf32> -> vector<16x384xf32>
    %6 = arith.addf %0, %5 : vector<16x384xf32>
    %c0_7 = arith.constant 0 : index
    %c0_8 = arith.constant 0 : index
    %c0_9 = arith.constant 0 : index
    %c1 = arith.constant 1 : index
    %7 = vector.load %arg3[%c0_7, %c0_8, %c0_9, %c1] : memref<1x1x8x512xbf16, #tpu.memory_space<vmem>>, vector<1x1x8x384xbf16>
    %8 = vector.shape_cast %7 : vector<1x1x8x384xbf16> to vector<8x384xbf16>
    %c1_10 = arith.constant 1 : index
    %c0_11 = arith.constant 0 : index
    %c0_12 = arith.constant 0 : index
    %9 = vector.load %arg2[%c1_10, %c0_11, %c0_12] : memref<9x16x8xbf16, #tpu.memory_space<vmem>>, vector<1x16x8xbf16>
    %10 = vector.shape_cast %9 : vector<1x16x8xbf16> to vector<16x8xbf16>
    %cst_13 = arith.constant dense<0.000000e+00> : vector<16x384xf32>
    %11 = tpu.matmul %10, %8, %cst_13 {dimension_numbers = #tpu.dot_dimension_numbers<[1], [0], [0], [1], [0, 0, 1, 1], [], []>} : vector<16x8xbf16>, vector<8x384xbf16>, vector<16x384xf32> -> vector<16x384xf32>
    %12 = arith.addf %6, %11 : vector<16x384xf32>
    %c0_14 = arith.constant 0 : index
    %c0_15 = arith.constant 0 : index
    %c0_16 = arith.constant 0 : index
    %c2 = arith.constant 2 : index
    %13 = vector.load %arg3[%c0_14, %c0_15, %c0_16, %c2] : memref<1x1x8x512xbf16, #tpu.memory_space<vmem>>, vector<1x1x8x384xbf16>
    %14 = vector.shape_cast %13 : vector<1x1x8x384xbf16> to vector<8x384xbf16>
    %c2_17 = arith.constant 2 : index
    %c0_18 = arith.constant 0 : index
    %c0_19 = arith.constant 0 : index
    %15 = vector.load %arg2[%c2_17, %c0_18, %c0_19] : memref<9x16x8xbf16, #tpu.memory_space<vmem>>, vector<1x16x8xbf16>
    %16 = vector.shape_cast %15 : vector<1x16x8xbf16> to vector<16x8xbf16>
    %cst_20 = arith.constant dense<0.000000e+00> : vector<16x384xf32>
    %17 = tpu.matmul %16, %14, %cst_20 {dimension_numbers = #tpu.dot_dimension_numbers<[1], [0], [0], [1], [0, 0, 1, 1], [], []>} : vector<16x8xbf16>, vector<8x384xbf16>, vector<16x384xf32> -> vector<16x384xf32>
    %18 = arith.addf %12, %17 : vector<16x384xf32>
    %c0_21 = arith.constant 0 : index
    %c0_22 = arith.constant 0 : index
    %c0_23 = arith.constant 0 : index
    %c18 = arith.constant 18 : index
    %19 = vector.load %arg3[%c0_21, %c0_22, %c0_23, %c18] : memref<1x1x8x512xbf16, #tpu.memory_space<vmem>>, vector<1x1x8x384xbf16>
    %20 = vector.shape_cast %19 : vector<1x1x8x384xbf16> to vector<8x384xbf16>
    %c3 = arith.constant 3 : index
    %c0_24 = arith.constant 0 : index
    %c0_25 = arith.constant 0 : index
    %21 = vector.load %arg2[%c3, %c0_24, %c0_25] : memref<9x16x8xbf16, #tpu.memory_space<vmem>>, vector<1x16x8xbf16>
    %22 = vector.shape_cast %21 : vector<1x16x8xbf16> to vector<16x8xbf16>
    %cst_26 = arith.constant dense<0.000000e+00> : vector<16x384xf32>
    %23 = tpu.matmul %22, %20, %cst_26 {dimension_numbers = #tpu.dot_dimension_numbers<[1], [0], [0], [1], [0, 0, 1, 1], [], []>} : vector<16x8xbf16>, vector<8x384xbf16>, vector<16x384xf32> -> vector<16x384xf32>
    %24 = arith.addf %18, %23 : vector<16x384xf32>
    %c0_27 = arith.constant 0 : index
    %c0_28 = arith.constant 0 : index
    %c0_29 = arith.constant 0 : index
    %c19 = arith.constant 19 : index
    %25 = vector.load %arg3[%c0_27, %c0_28, %c0_29, %c19] : memref<1x1x8x512xbf16, #tpu.memory_space<vmem>>, vector<1x1x8x384xbf16>
    %26 = vector.shape_cast %25 : vector<1x1x8x384xbf16> to vector<8x384xbf16>
    %c4 = arith.constant 4 : index
    %c0_30 = arith.constant 0 : index
    %c0_31 = arith.constant 0 : index
    %27 = vector.load %arg2[%c4, %c0_30, %c0_31] : memref<9x16x8xbf16, #tpu.memory_space<vmem>>, vector<1x16x8xbf16>
    %28 = vector.shape_cast %27 : vector<1x16x8xbf16> to vector<16x8xbf16>
    %cst_32 = arith.constant dense<0.000000e+00> : vector<16x384xf32>
    %29 = tpu.matmul %28, %26, %cst_32 {dimension_numbers = #tpu.dot_dimension_numbers<[1], [0], [0], [1], [0, 0, 1, 1], [], []>} : vector<16x8xbf16>, vector<8x384xbf16>, vector<16x384xf32> -> vector<16x384xf32>
    %30 = arith.addf %24, %29 : vector<16x384xf32>
    %c0_33 = arith.constant 0 : index
    %c0_34 = arith.constant 0 : index
    %c0_35 = arith.constant 0 : index
    %c20 = arith.constant 20 : index
    %31 = vector.load %arg3[%c0_33, %c0_34, %c0_35, %c20] : memref<1x1x8x512xbf16, #tpu.memory_space<vmem>>, vector<1x1x8x384xbf16>
    %32 = vector.shape_cast %31 : vector<1x1x8x384xbf16> to vector<8x384xbf16>
    %c5 = arith.constant 5 : index
    %c0_36 = arith.constant 0 : index
    %c0_37 = arith.constant 0 : index
    %33 = vector.load %arg2[%c5, %c0_36, %c0_37] : memref<9x16x8xbf16, #tpu.memory_space<vmem>>, vector<1x16x8xbf16>
    %34 = vector.shape_cast %33 : vector<1x16x8xbf16> to vector<16x8xbf16>
    %cst_38 = arith.constant dense<0.000000e+00> : vector<16x384xf32>
    %35 = tpu.matmul %34, %32, %cst_38 {dimension_numbers = #tpu.dot_dimension_numbers<[1], [0], [0], [1], [0, 0, 1, 1], [], []>} : vector<16x8xbf16>, vector<8x384xbf16>, vector<16x384xf32> -> vector<16x384xf32>
    %36 = arith.addf %30, %35 : vector<16x384xf32>
    %c0_39 = arith.constant 0 : index
    %c0_40 = arith.constant 0 : index
    %c0_41 = arith.constant 0 : index
    %c36 = arith.constant 36 : index
    %37 = vector.load %arg3[%c0_39, %c0_40, %c0_41, %c36] : memref<1x1x8x512xbf16, #tpu.memory_space<vmem>>, vector<1x1x8x384xbf16>
    %38 = vector.shape_cast %37 : vector<1x1x8x384xbf16> to vector<8x384xbf16>
    %c6 = arith.constant 6 : index
    %c0_42 = arith.constant 0 : index
    %c0_43 = arith.constant 0 : index
    %39 = vector.load %arg2[%c6, %c0_42, %c0_43] : memref<9x16x8xbf16, #tpu.memory_space<vmem>>, vector<1x16x8xbf16>
    %40 = vector.shape_cast %39 : vector<1x16x8xbf16> to vector<16x8xbf16>
    %cst_44 = arith.constant dense<0.000000e+00> : vector<16x384xf32>
    %41 = tpu.matmul %40, %38, %cst_44 {dimension_numbers = #tpu.dot_dimension_numbers<[1], [0], [0], [1], [0, 0, 1, 1], [], []>} : vector<16x8xbf16>, vector<8x384xbf16>, vector<16x384xf32> -> vector<16x384xf32>
    %42 = arith.addf %36, %41 : vector<16x384xf32>
    %c0_45 = arith.constant 0 : index
    %c0_46 = arith.constant 0 : index
    %c0_47 = arith.constant 0 : index
    %c37 = arith.constant 37 : index
    %43 = vector.load %arg3[%c0_45, %c0_46, %c0_47, %c37] : memref<1x1x8x512xbf16, #tpu.memory_space<vmem>>, vector<1x1x8x384xbf16>
    %44 = vector.shape_cast %43 : vector<1x1x8x384xbf16> to vector<8x384xbf16>
    %c7 = arith.constant 7 : index
    %c0_48 = arith.constant 0 : index
    %c0_49 = arith.constant 0 : index
    %45 = vector.load %arg2[%c7, %c0_48, %c0_49] : memref<9x16x8xbf16, #tpu.memory_space<vmem>>, vector<1x16x8xbf16>
    %46 = vector.shape_cast %45 : vector<1x16x8xbf16> to vector<16x8xbf16>
    %cst_50 = arith.constant dense<0.000000e+00> : vector<16x384xf32>
    %47 = tpu.matmul %46, %44, %cst_50 {dimension_numbers = #tpu.dot_dimension_numbers<[1], [0], [0], [1], [0, 0, 1, 1], [], []>} : vector<16x8xbf16>, vector<8x384xbf16>, vector<16x384xf32> -> vector<16x384xf32>
    %48 = arith.addf %42, %47 : vector<16x384xf32>
    %c0_51 = arith.constant 0 : index
    %c0_52 = arith.constant 0 : index
    %c0_53 = arith.constant 0 : index
    %c38 = arith.constant 38 : index
    %49 = vector.load %arg3[%c0_51, %c0_52, %c0_53, %c38] : memref<1x1x8x512xbf16, #tpu.memory_space<vmem>>, vector<1x1x8x384xbf16>
    %50 = vector.shape_cast %49 : vector<1x1x8x384xbf16> to vector<8x384xbf16>
    %c8 = arith.constant 8 : index
    %c0_54 = arith.constant 0 : index
    %c0_55 = arith.constant 0 : index
    %51 = vector.load %arg2[%c8, %c0_54, %c0_55] : memref<9x16x8xbf16, #tpu.memory_space<vmem>>, vector<1x16x8xbf16>
    %52 = vector.shape_cast %51 : vector<1x16x8xbf16> to vector<16x8xbf16>
    %cst_56 = arith.constant dense<0.000000e+00> : vector<16x384xf32>
    %53 = tpu.matmul %52, %50, %cst_56 {dimension_numbers = #tpu.dot_dimension_numbers<[1], [0], [0], [1], [0, 0, 1, 1], [], []>} : vector<16x8xbf16>, vector<8x384xbf16>, vector<16x384xf32> -> vector<16x384xf32>
    %54 = arith.addf %48, %53 : vector<16x384xf32>
    %c0_57 = arith.constant 0 : index
    %c0_58 = arith.constant 0 : index
    %55 = vector.load %arg4[%c0_57, %c0_58] : memref<16x1xf32, #tpu.memory_space<vmem>>, vector<16x1xf32>
    %56 = vector.broadcast %55 : vector<16x1xf32> to vector<16x384xf32>
    %57 = arith.addf %54, %56 : vector<16x384xf32>
    %c0_59 = arith.constant 0 : index
    %c0_60 = arith.constant 0 : index
    %c0_61 = arith.constant 0 : index
    %58 = vector.load %arg5[%c0_59, %c0_60, %c0_61] : memref<1x16x384xf32, #tpu.memory_space<vmem>>, vector<1x16x384xf32>
    %59 = vector.shape_cast %58 : vector<1x16x384xf32> to vector<16x384xf32>
    %60 = vector.shape_cast %57 : vector<16x384xf32> to vector<1x16x384xf32>
    tpu.vector_store %arg5[%c0_59, %c0_60, %c0_61], %60 {strides = array<i32>} : memref<1x16x384xf32, #tpu.memory_space<vmem>>, vector<1x16x384xf32>,
    return
  }
  func.func @transform_0(%arg0: i32, %arg1: i32) -> (i32, i32, i32) {
    %c0_i32 = arith.constant 0 : i32
    %c0_i32_0 = arith.constant 0 : i32
    %c0_i32_1 = arith.constant 0 : i32
    %c0_i32_2 = arith.constant 0 : i32
    return %c0_i32, %c0_i32_0, %c0_i32_1 : i32, i32, i32
  }
  func.func @transform_1(%arg0: i32, %arg1: i32) -> (i32, i32, i32, i32) {
    %c0_i32 = arith.constant 0 : i32
    %c0_i32_0 = arith.constant 0 : i32
    %c0_i32_1 = arith.constant 0 : i32
    return %arg0, %arg1, %c0_i32, %c0_i32_0 : i32, i32, i32, i32
  }
  func.func @transform_2(%arg0: i32, %arg1: i32) -> (i32, i32) {
    %c0_i32 = arith.constant 0 : i32
    %c0_i32_0 = arith.constant 0 : i32
    %c0_i32_1 = arith.constant 0 : i32
    return %c0_i32, %c0_i32_0 : i32, i32
  }
  func.func @transform_3(%arg0: i32, %arg1: i32) -> (i32, i32, i32) {
    %c0_i32 = arith.constant 0 : i32
    %c0_i32_0 = arith.constant 0 : i32
    return %arg0, %c0_i32, %arg1 : i32, i32, i32
  }
}

</mosaic_0001>

<bundles_post_ra>
// kernel: tpu_custom_call.1
= control target key start
LH: loop header
LB: loop body
LE: loop exit
PB: predicated region body
PF: predicated region fallthrough
CT: control target
= control target key end

     0   :  { %8 = vsyncpa [#allocation3], 0  ;;  %s2067_s0 = inlined_call_operand.vmem [shape: bf16[9,16,8], index: 0, kind: input, shape index: {}]   ;;  %s2068_s1 = inlined_call_operand.vmem [shape: bf16[2,1,8,512], index: 1, kind: input, shape index: {}]   ;;  %s2069_s2 = inlined_call_operand.vmem [shape: f32[16,1], index: 2, kind: input, shape index: {}]   ;;  %s2070_s3 = inlined_call_operand.hbm [shape: f32[2,16,384], index: 3, kind: output, shape index: {}]  }
   0x1   :  { %10 = vsyncpa [#allocation3 + $0x1], 0  ;;  %s1792_s12 = smov 0   ;;  %s1794_s13 = smov 0  }
   0x2   :  { %s1796_s14 = smov 0   ;;  %s1798_s15 = smov 0  }
   0x3   :  { %s1800_s16 = smov 0   ;;  %s1802_s17 = smov 0  }
   0x4 LB: > { %s1418_s18 = sadd.s32 4294967295, %s1756_s17   ;;  %s1419_s19 = sadd.s32 4294967294, %s1756_s17   ;;  %s1756_s17 = sphi %s1802_s17, %s16_s17   ;;  %s1752_s16 = sphi %s1800_s16, %s2077_s16   ;;  %s1748_s15 = sphi %s1798_s15, %s2076_s15   ;;  %s1744_s14 = sphi %s1796_s14, %s2075_s14   ;;  %s1740_s13 = sphi %s1794_s13, %s2074_s13   ;;  %s1736_s12 = sphi %s1792_s12, %s2073_s12  }
   0x5   : > { %s28_s20 = sadd.s32 1, %s1752_s16  ;;  %s107_s21 = sadd.s32 1, %s1744_s14 }
   0x6   : > { %p30_p0 = scmp.ge.s32.totalorder %s28_s20, 2  ;;  %p117_p1 = scmp.ne.s32.totalorder %s1744_s14, %s1740_s13 }
   0x7   : > { %p118_p2 = scmp.eq.s32.totalorder %s1418_s18, 1  ;;  %p123_p3 = scmp.ne.s32.totalorder %s1740_s13, %s1736_s12 }
   0x8   : > { %s2079_s20 = smov (%p30_p0, %s28_s20), 0  ;;  %p124_p5 = scmp.eq.s32.totalorder %s1419_s19, 1 }
   0x9   : > { %p1832_p4 = por %p118_p2, %p117_p1  ;;  %s102_s23 = ssub.s32 %s1752_s16, %s2079_s20 }
   0xa   : > { %p1422_p6 = scmp.ge.s32.totalorder %s1756_s17, 1  ;;  %p105_p7 = scmp.eq.s32.totalorder %s102_s23, 0 }
   0xb   : > { %p1839_p8 = por %p124_p5, %p123_p3  ;;  %p160_p9 = scmp.lt.s32.totalorder %s1756_s17, 3 }
   0xc   : > { %s1845_s25 = scalar_select %p105_p7, %s1744_s14, %s107_s21  }
   0xd   : > { %p161_p10 = pnand %p1422_p6, %p160_p9 }
   0xe   : > { %p188_p11 = scmp.lt.s32.totalorder (!%p161_p10), %s1748_s15, 1  ;;  %v1758_v0 = vmov (!%p161_p10), 0   ;;  %s1759_s4 = smov (!%p161_p10), 127   ;;  %v1760_v6 = vmov (!%p161_p10), 0.0   ;;  %vm1761_vm0 = vmmov (!%p161_p10), 0   ;;  %v1296_v8 = vld [vmem:[%s2069_s2] sm:$0xff] (!%p161_p10) }
   0xf   : > { %164 = sbr.rel (%p161_p10) target bundleno = 481 (0x1e1), region = 32  ;;  %281 = vmatprep.mubr.bf16.mxu0 (!%p161_p10), %v1758_v0  ;;  %1662 = vset.pattern.permute.xlu0 (!%p161_p10), %v1758_v0  ;;  %s1762_s5 = smov (!%p161_p10), 126   ;;  %v1297_v9 = vld [vmem:[%s2069_s2 + $0x8] sm:$0xff] (!%p161_p10)  ;;  %vm231_vm1 = vcmask (!%p161_p10), 1039360   ;;  %vm239_vm2 = vcmask (!%p161_p10), 1043456   ;;  %vm458_vm3 = vcmask (!%p161_p10), 1031168  }
  0x10   : > { %1663 = vset.pattern.permute.xlu1 (!%p161_p10), %v1758_v0  ;;  %1506 = vmatprep.subr.bf16.mxu1 (!%p161_p10), %v1760_v6  ;;  %s1763_s6 = smov (!%p161_p10), 110   ;;  %s1764_s7 = smov (!%p161_p10), 109   ;;  %v1668_v17 = vld [vmem:[%s2067_s0 + $0x8] sm:$0xff] (!%p161_p10)   ;;  %vm235_vm4 = vcmask (!%p161_p10), 64512   ;;  %v1669_v31 = vld [vmem:[%s2067_s0] sm:$0xff] (!%p161_p10)   ;;  %vm580_vm5 = vcmask (!%p161_p10), 900096  }
  0x11   : > { %1508 = vmatprep.mubr.msk.bf16.mxu1 (!%p161_p10), %vm1761_vm0, %v1760_v6  ;;  %s1765_s8 = smov (!%p161_p10), 108   ;;  %s1766_s9 = smov (!%p161_p10), 92   ;;  %v1671_v44 = vld [vmem:[%s2067_s0 + $0x10] sm:$0xff] (!%p161_p10)   ;;  %vm702_vm6 = vcmask (!%p161_p10), 891904   ;;  %v1672_v53 = vld [vmem:[%s2067_s0 + $0x18] sm:$0xff] (!%p161_p10)   ;;  %vm824_vm7 = vcmask (!%p161_p10), 883712  }
  0x12   : > { %s1767_s10 = smov (!%p161_p10), 91   ;;  %s1768_s11 = smov (!%p161_p10), 90   ;;  %v1673_v61 = vld [vmem:[%s2067_s0 + $0x20] sm:$0xff] (!%p161_p10)   ;;  %vm946_vm8 = vcmask (!%p161_p10), 752640   ;;  %vm1068_vm9 = vcmask (!%p161_p10), 744448   ;;  %vm1190_vm10 = vcmask (!%p161_p10), 736256  }
  0x16   : > { %s189_s26 = scalar_select %p188_p11, %s1748_s15, 1 }
  0x18   : > { %s1487_s27 = sshll.u32 %s189_s26, 4 }
  0x19   : > { %s1854_s30 = scalar_lea.vmem %s2068_s1, %s1487_s27  ;;  %s185_s27 = sand.u32 1, %s1740_s13  }
  0x1a   : > { %v203_v1 = vld [vmem:[%s1854_s30] sm:$0xff]  ;;  %v204_v2 = vld [vmem:[%s1854_s30 + $0x8] sm:$0xff]  ;;  %s1592_s28 = smul.u32 48, %s185_s27 }
  0x1b   : > { %v1859_v3 = vcombine.low %v203_v1, %v203_v1  ;;  %v1430_v4 = vcombine.low %v204_v2, %v204_v2  ;;  %v1429_v5 = vcombine.high %v203_v1, %v203_v1  ;;  %v1431_v7 = vcombine.high %v204_v2, %v204_v2  ;;  %v1670_v23 = vld [vmem:[%s1854_s30 + $0x8] ss:$0 sps:$4 sm:$0xff]   ;;  %s1593_s30 = smul.u32 768, %s1748_s15 }
  0x1c   : > { %v356_v28 = vsel %vm239_vm2, %v1670_v23, 0  ;;  %s187_s29 = scalar_lea.vmem [#allocation2], %s1592_s28 }
  0x1d   : > { %223 = vrot.lane.b32.xlu0 %v1859_v3, %s1759_s4  ;;  %227 = vrot.lane.b32.xlu1 %v1430_v4, %s1759_s4  ;;  %v350_v19 = vsel %vm239_vm2, %v1859_v3, 0  ;;  %s2017_s15 = scalar_lea.hbm %s2070_s3, %s1593_s30 }
  0x21   : > { %225 = vrot.lane.b32.xlu0 %v1429_v5, %s1759_s4  ;;  %450 = vrot.lane.b32.xlu1 %v1859_v3, %s1762_s5 }
  0x25   : > { %452 = vrot.lane.b32.xlu0 %v1429_v5, %s1762_s5  ;;  %454 = vrot.lane.b32.xlu1 %v1430_v4, %s1762_s5 }
  0x29   : > { %229 = vrot.lane.b32.xlu0 %v1431_v7, %s1759_s4  ;;  %572 = vrot.lane.b32.xlu1 %v1859_v3, %s1763_s6  ;;  %s1336_s4 = sshll.u32 %s187_s29, 4  ;;  %s2012_s4 = int_to_ptr.vmem [resolvable:$true] %s1336_s4 }
  0x2d   : > { %574 = vrot.lane.b32.xlu0 %v1429_v5, %s1763_s6  ;;  %576 = vrot.lane.b32.xlu1 %v1430_v4, %s1763_s6 }
  0x31   : > { %456 = vrot.lane.b32.xlu0 %v1431_v7, %s1762_s5  ;;  %694 = vrot.lane.b32.xlu1 %v1859_v3, %s1764_s7 }
  0x35   : > { %696 = vrot.lane.b32.xlu0 %v1429_v5, %s1764_s7  ;;  %698 = vrot.lane.b32.xlu1 %v1430_v4, %s1764_s7 }
  0x39   : > { %578 = vrot.lane.b32.xlu0 %v1431_v7, %s1763_s6  ;;  %816 = vrot.lane.b32.xlu1 %v1859_v3, %s1765_s8 }
  0x3d   : > { %818 = vrot.lane.b32.xlu0 %v1429_v5, %s1765_s8  ;;  %820 = vrot.lane.b32.xlu1 %v1430_v4, %s1765_s8 }
  0x41   : > { %700 = vrot.lane.b32.xlu0 %v1431_v7, %s1764_s7  ;;  %822 = vrot.lane.b32.xlu1 %v1431_v7, %s1765_s8  ;;  %s2021_s7 = scalar_lea.sflag [#allocation3], %s185_s27  ;;  %s1678_s8 = scalar_lea.vmem %s2012_s4, 768 }
  0x42   : > { %p1679_p12 = scmp.ne.s32.totalorder %s2012_s4, %s1678_s8 }
  0x44   : > { %p1680_p13 = pnand %p1679_p12, %p1832_p4 }
  0x45   : > { %940 = vrot.lane.b32.xlu1 %v1429_v5, %s1766_s9  ;;  %938 = vrot.lane.b32.xlu0 %v1859_v3, %s1766_s9 }
  0x46   : > { %p1681_p0 = pneg %p1680_p13 }
  0x49   : > { %944 = vrot.lane.b32.xlu1 %v1431_v7, %s1766_s9  ;;  %942 = vrot.lane.b32.xlu0 %v1430_v4, %s1766_s9  ;;  %s1769_s9 = smov [#allocation2]  }
  0x4d   : > { %1062 = vrot.lane.b32.xlu1 %v1429_v5, %s1767_s10  ;;  %1060 = vrot.lane.b32.xlu0 %v1859_v3, %s1767_s10 }
  0x51   : > { %1066 = vrot.lane.b32.xlu1 %v1431_v7, %s1767_s10  ;;  %1064 = vrot.lane.b32.xlu0 %v1430_v4, %s1767_s10  ;;  %s1682_s10 = sshll.u32 %s1769_s9, 4  ;;  %s1683_s10 = int_to_ptr.vmem [resolvable:$false] %s1682_s10 }
  0x52   : > { %p1685_p1 = scmp.lt.s32.totalorder %s2012_s4, %s1683_s10 }
  0x55   : > { %1188 = vrot.lane.b32.xlu1 %v1431_v7, %s1768_s11  ;;  %1186 = vrot.lane.b32.xlu0 %v1430_v4, %s1768_s11  ;;  %v1674_v7 = vld [vmem:[%s2067_s0 + $0x28] sm:$0xff]  }
  0x59   : > { %1184 = vrot.lane.b32.xlu1 %v1429_v5, %s1768_s11  ;;  %1182 = vrot.lane.b32.xlu0 %v1859_v3, %s1768_s11  ;;  %s1684_s11 = scalar_lea.vmem %s1683_s10, 1536 }
  0x5a   : > { %p1686_p2 = scmp.lt.s32.totalorder %s1684_s11, %s1678_s8 }
  0x5c   : > { %p1687_p3 = por %p1686_p2, %p1685_p1 }
  0x5d   : > { %1300 = vperm.xlu0 %1662, %v1296_v8   ;;  %1305 = vperm.xlu1 %1663, %v1297_v9  }
  0x5e   : > { %p1688_p5 = pnand %p1687_p3, %p1681_p0 }
  0x8f   : > { %v224_v10 = vpop.permute.xlu0 %223  ;;  %v228_v11 = vpop.permute.xlu1 %227 }
  0x93   : > { %v226_v12 = vpop.permute.xlu0 %225  ;;  %v451_v13 = vpop.permute.xlu1 %450 }
  0x94   : > { %v233_v14 = vsel %vm231_vm1, %v226_v12, %v228_v11  ;;  %v232_v15 = vsel %vm231_vm1, %v224_v10, %v226_v12 }
  0x95   : > { %1432 = vmatprep.subr.msk.bf16.mxu0 %vm239_vm2, %v233_v14  ;;  %v241_v16 = vsel %vm239_vm2, %v232_v15, 0  ;;  %v1675_v14 = vld [vmem:[%s2067_s0 + $0x30] sm:$0xff]  }
  0x96   : > { %250 = vmatpush1.bf16.msra.mxu0 %v241_v16 }
  0x97   : > { %v453_v18 = vpop.permute.xlu0 %452  ;;  %1439 = vmatprep.subr.msk.bf16.mxu0 %vm239_vm2, %v1429_v5  ;;  %v455_v20 = vpop.permute.xlu1 %454 }
  0x98   : > { %v460_v21 = vsel %vm458_vm3, %v453_v18, %v455_v20  ;;  %v459_v30 = vsel %vm458_vm3, %v451_v13, %v453_v18 }
  0x99   : > { %1433 = vmatmul.mubr.msk.bf16.vlgmr.msra.gmra.mrb[0].mxu0 %vm235_vm4, %v1668_v17  ;;  %v466_v32 = vsel %vm239_vm2, %v459_v30, 0 }
  0x9a   : > { %359 = vmatpush1.bf16.msra.mxu0 %v350_v19  ;;  %390 = vmatprep.mubr.bf16.mxu0 %v1758_v0 }
  0x9b   : > { %v230_v22 = vpop.permute.xlu0 %229  ;;  %1445 = vmatprep.subr.msk.bf16.mxu0 %vm239_vm2, %v460_v21  ;;  %v573_v24 = vpop.permute.xlu1 %572 }
  0x9c   : > { %v234_v25 = vsel %vm231_vm1, %v228_v11, %v230_v22  ;;  %v1676_v22 = vld [vmem:[%s2067_s0 + $0x38] sm:$0xff]  }
  0x9d   : > { %v247_v26 = vsel %vm239_vm2, %v234_v25, 0  ;;  %v1677_v25 = vld [vmem:[%s2067_s0 + $0x40] sm:$0xff]  }
  0x9e   : > { %1507 = vmatpush3.bf16.msra.mxu1 %v247_v26 }
  0x9f   : > { %v575_v27 = vpop.permute.xlu0 %574  ;;  %1512 = vmatprep.subr.bf16.mxu1 %v1760_v6  ;;  %v577_v29 = vpop.permute.xlu1 %576 }
  0xa0   : > { %v582_v36 = vsel %vm580_vm5, %v575_v27, %v577_v29  ;;  %v581_v42 = vsel %vm580_vm5, %v573_v24, %v575_v27 }
  0xa1   : > { %1509 = vmatmul.mubr.msk.bf16.vlgmr.msra.gmra.mrb[0].mxu1 %vm235_vm4, %v1668_v17  ;;  %v588_v45 = vsel %vm239_vm2, %v581_v42, 0 }
  0xa2   : > { %1513 = vmatpush3.bf16.msra.mxu1 %v356_v28  ;;  %1514 = vmatprep.mubr.msk.bf16.mxu1 %vm1761_vm0, %v1760_v6 }
  0xa3   : > { %v457_v33 = vpop.permute.xlu0 %456  ;;  %1518 = vmatprep.subr.bf16.mxu1 %v1760_v6  ;;  %v695_v34 = vpop.permute.xlu1 %694 }
  0xa4   : > { %v461_v35 = vsel %vm458_vm3, %v455_v20, %v457_v33 }
  0xa5   : > { %1440 = vmatmul.mubr.msk.bf16.vlgmr.msra.gmra.mrb[0].mxu0 %vm235_vm4, %v1669_v31  ;;  %v472_v37 = vsel %vm239_vm2, %v461_v35, 0 }
  0xa6   : > { %475 = vmatpush1.bf16.msra.mxu0 %v466_v32  ;;  %506 = vmatprep.mubr.bf16.mxu0 %v1758_v0 }
  0xa7   : > { %v697_v38 = vpop.permute.xlu0 %696  ;;  %1451 = vmatprep.subr.msk.bf16.mxu0 %vm239_vm2, %v582_v36  ;;  %v699_v39 = vpop.permute.xlu1 %698 }
  0xa8   : > { %v704_v49 = vsel %vm702_vm6, %v697_v38, %v699_v39  ;;  %v703_v57 = vsel %vm702_vm6, %v695_v34, %v697_v38 }
  0xa9   : > { %1515 = vmatmul.mubr.msk.bf16.vlgmr.msra.gmra.mrb[4].mxu1 %vm235_vm4, %v1669_v31  ;;  %v710_v58 = vsel %vm239_vm2, %v703_v57, 0 }
  0xaa   : > { %1519 = vmatpush3.bf16.msra.mxu1 %v472_v37  ;;  %1520 = vmatprep.mubr.msk.bf16.mxu1 %vm1761_vm0, %v1760_v6 }
  0xab   : > { %v579_v40 = vpop.permute.xlu0 %578  ;;  %1524 = vmatprep.subr.bf16.mxu1 %v1760_v6  ;;  %v817_v41 = vpop.permute.xlu1 %816 }
  0xac   : > { %v583_v43 = vsel %vm580_vm5, %v577_v29, %v579_v40 }
  0xad   : > { %v594_v46 = vsel %vm239_vm2, %v583_v43, 0 }
  0xaf   : > { %v819_v47 = vpop.permute.xlu0 %818  ;;  %v821_v48 = vpop.permute.xlu1 %820 }
  0xb0   : > { %v826_v59 = vsel %vm824_vm7, %v819_v47, %v821_v48  ;;  %v825_v4 = vsel %vm824_vm7, %v817_v41, %v819_v47 }
  0xb1   : > { %1446 = vmatmul.mubr.msk.bf16.vlgmr.msra.gmra.mrb[0].mxu0 %vm235_vm4, %v1671_v44  ;;  %1521 = vmatmul.mubr.msk.bf16.vlgmr.msra.gmra.mrb[8].mxu1 %vm235_vm4, %v1671_v44  ;;  %v832_v8 = vsel %vm239_vm2, %v825_v4, 0 }
  0xb2   : > { %597 = vmatpush1.bf16.msra.mxu0 %v588_v45  ;;  %1525 = vmatpush3.bf16.msra.mxu1 %v594_v46 }
  0xb3   : > { %1526 = vmatprep.mubr.msk.bf16.mxu1 %vm1761_vm0, %v1760_v6  ;;  %v701_v50 = vpop.permute.xlu0 %700  ;;  %628 = vmatprep.mubr.bf16.mxu0 %v1758_v0  ;;  %v823_v51 = vpop.permute.xlu1 %822 }
  0xb4   : > { %v705_v52 = vsel %vm702_vm6, %v699_v39, %v701_v50  ;;  %1457 = vmatprep.subr.msk.bf16.mxu0 %vm239_vm2, %v704_v49  ;;  %1530 = vmatprep.subr.bf16.mxu1 %v1760_v6  ;;  %v827_v60 = vsel %vm824_vm7, %v821_v48, %v823_v51 }
  0xb5   : > { %v716_v54 = vsel %vm239_vm2, %v705_v52, 0  ;;  %v838_v1 = vsel %vm239_vm2, %v827_v60, 0 }
  0xb7   : > { %v941_v55 = vpop.permute.xlu1 %940  ;;  %v939_v56 = vpop.permute.xlu0 %938 }
  0xb8   : > { %v947_v16 = vsel %vm946_vm8, %v939_v56, %v941_v55 }
  0xb9   : > { %1527 = vmatmul.mubr.msk.bf16.vlgmr.msra.gmra.mrb[12].mxu1 %vm235_vm4, %v1672_v53  ;;  %v954_v19 = vsel %vm239_vm2, %v947_v16, 0 }
  0xba   : > { %1531 = vmatpush3.bf16.msra.mxu1 %v716_v54  ;;  %1532 = vmatprep.mubr.msk.bf16.mxu1 %vm1761_vm0, %v1760_v6 }
  0xbb   : > { %1536 = vmatprep.subr.bf16.mxu1 %v1760_v6  ;;  %v945_v62 = vpop.permute.xlu1 %944  ;;  %v943_v63 = vpop.permute.xlu0 %942 }
  0xbc   : > { %v949_v5 = vsel %vm946_vm8, %v943_v63, %v945_v62  ;;  %v948_v10 = vsel %vm946_vm8, %v941_v55, %v943_v63 }
  0xbd   : > { %1452 = vmatmul.mubr.msk.bf16.vlgmr.msra.gmra.mrb[0].mxu0 %vm235_vm4, %v1672_v53  ;;  %v960_v9 = vsel %vm239_vm2, %v949_v5, 0 }
  0xbe   : > { %719 = vmatpush1.bf16.msra.mxu0 %v710_v58  ;;  %750 = vmatprep.mubr.bf16.mxu0 %v1758_v0 }
  0xbf   : > { %1463 = vmatprep.subr.msk.bf16.mxu0 %vm239_vm2, %v826_v59  ;;  %v1063_v2 = vpop.permute.xlu1 %1062  ;;  %v1061_v3 = vpop.permute.xlu0 %1060 }
  0xc0   : > { %v1069_v24 = vsel %vm1068_vm9, %v1061_v3, %v1063_v2 }
  0xc1   : > { %1533 = vmatmul.mubr.msk.bf16.vlgmr.msra.gmra.mrb[16].mxu1 %vm235_vm4, %v1673_v61  ;;  %v1076_v27 = vsel %vm239_vm2, %v1069_v24, 0 }
  0xc2   : > { %1537 = vmatpush3.bf16.msra.mxu1 %v838_v1  ;;  %1538 = vmatprep.mubr.msk.bf16.mxu1 %vm1761_vm0, %v1760_v6 }
  0xc3   : > { %1542 = vmatprep.subr.bf16.mxu1 %v1760_v6  ;;  %v1067_v11 = vpop.permute.xlu1 %1066  ;;  %v1065_v12 = vpop.permute.xlu0 %1064 }
  0xc4   : > { %v1071_v13 = vsel %vm1068_vm9, %v1065_v12, %v1067_v11  ;;  %v1070_v20 = vsel %vm1068_vm9, %v1063_v2, %v1065_v12 }
  0xc5   : > { %v1082_v15 = vsel %vm239_vm2, %v1071_v13, 0 }
  0xc7   : > { %v1189_v17 = vpop.permute.xlu1 %1188  ;;  %v1187_v18 = vpop.permute.xlu0 %1186 }
  0xc8   : > { %v1193_v21 = vsel %vm1190_vm10, %v1187_v18, %v1189_v17 }
  0xc9   : > { %1458 = vmatmul.mubr.msk.bf16.vlgmr.msra.gmra.mrb[0].mxu0 %vm235_vm4, %v1673_v61  ;;  %1539 = vmatmul.mubr.msk.bf16.vlgmr.msra.gmra.mrb[20].mxu1 %vm235_vm4, %v1674_v7  ;;  %v1204_v23 = vsel %vm239_vm2, %v1193_v21, 0 }
  0xca   : > { %841 = vmatpush1.bf16.msra.mxu0 %v832_v8  ;;  %1543 = vmatpush3.bf16.msra.mxu1 %v960_v9 }
  0xcb   : > { %1544 = vmatprep.mubr.msk.bf16.mxu1 %vm1761_vm0, %v1760_v6  ;;  %872 = vmatprep.mubr.bf16.mxu0 %v1758_v0  ;;  %v1185_v26 = vpop.permute.xlu1 %1184 }
  0xcc   : > { %1469 = vmatprep.subr.msk.bf16.mxu0 %vm239_vm2, %v948_v10  ;;  %1548 = vmatprep.subr.bf16.mxu1 %v1760_v6  ;;  %v1192_v28 = vsel %vm1190_vm10, %v1185_v26, %v1187_v18 }
  0xd1   : > { %1545 = vmatmul.mubr.msk.bf16.vlgmr.msra.gmra.mrb[24].mxu1 %vm235_vm4, %v1675_v14 }
  0xd2   : > { %1549 = vmatpush3.bf16.msra.mxu1 %v1082_v15  ;;  %1550 = vmatprep.mubr.msk.bf16.mxu1 %vm1761_vm0, %v1760_v6 }
  0xd3   : > { %1554 = vmatprep.subr.bf16.mxu1 %v1760_v6 }
  0xd5   : > { %1464 = vmatmul.mubr.msk.bf16.vlgmr.msra.gmra.mrb[0].mxu0 %vm235_vm4, %v1674_v7 }
  0xd6   : > { %963 = vmatpush1.bf16.msra.mxu0 %v954_v19  ;;  %994 = vmatprep.mubr.bf16.mxu0 %v1758_v0 }
  0xd7   : > { %1475 = vmatprep.subr.msk.bf16.mxu0 %vm239_vm2, %v1070_v20 }
  0xd9   : > { %1551 = vmatmul.mubr.msk.bf16.vlgmr.msra.gmra.mrb[28].mxu1 %vm235_vm4, %v1676_v22 }
  0xda   : > { %1555 = vmatpush3.bf16.msra.mxu1 %v1204_v23  ;;  %1556 = vmatprep.mubr.msk.bf16.mxu1 %vm1761_vm0, %v1760_v6  ;;  %v1183_v6 = vpop.permute.xlu0 %1182 }
  0xdb   : > { %v1191_v29 = vsel %vm1190_vm10, %v1183_v6, %v1185_v26 }
  0xdc   : > { %v1198_v30 = vsel %vm239_vm2, %v1191_v29, 0  ;;  %v1306_v19 = vpop.permute.xlu1 %1305 }
  0xde   : > { %v1301_v15 = vpop.permute.xlu0 %1300 }
  0xe1   : > { %1470 = vmatmul.mubr.msk.bf16.vlgmr.msra.gmra.mrb[0].mxu0 %vm235_vm4, %v1675_v14  ;;  %1557 = vmatmul.mubr.msk.bf16.vlgmr.msra.gmra.mrb[32].mxu1 %vm235_vm4, %v1677_v25 }
  0xe2   : > { %1085 = vmatpush1.bf16.msra.mxu0 %v1076_v27  ;;  %1116 = vmatprep.mubr.bf16.mxu0 %v1758_v0 }
  0xe3   : > { %1481 = vmatprep.subr.msk.bf16.mxu0 %vm239_vm2, %v1192_v28 }
  0xed   : > { %1476 = vmatmul.mubr.msk.bf16.vlgmr.msra.gmra.mrb[0].mxu0 %vm235_vm4, %v1676_v22 }
  0xee   : > { %1207 = vmatpush1.bf16.msra.mxu0 %v1198_v30  ;;  %1238 = vmatprep.mubr.bf16.mxu0 %v1758_v0 }
  0xf9   : > { %1482 = vmatmul.mubr.msk.bf16.vlgmr.msra.gmra.mrb[0].mxu0 %vm235_vm4, %v1677_v25 }
 0x174   : > { %v326_v31 = vpop.f32.mrb[0].mxu1 }
 0x175   : > { %v1510_v32 = vpop.f32.mrb[1].mxu1 }
 0x176   : > { %v329_v33 = vpop.f32.mrb[2].mxu1 }
 0x177   : > { %v1511_v34 = vpop.f32.mrb[3].mxu1 }
 0x17c   : > { %v435_v35 = vpop.f32.mrb[4].mxu1 }
 0x17d   : > { %v436_v36 = vadd.f32 %v435_v35, %v326_v31  ;;  %v1516_v37 = vpop.f32.mrb[5].mxu1 }
 0x17e   : > { %v438_v38 = vpop.f32.mrb[6].mxu1 }
 0x17f   : > { %v439_v39 = vadd.f32 %v438_v38, %v329_v33  ;;  %v1517_v40 = vpop.f32.mrb[7].mxu1 }
 0x184   : > { %v551_v41 = vpop.f32.mrb[8].mxu1 }
 0x185   : > { %v560_v42 = vadd.f32 %v551_v41, %v436_v36  ;;  %v1522_v43 = vpop.f32.mrb[9].mxu1 }
 0x186   : > { %v554_v44 = vpop.f32.mrb[10].mxu1 }
 0x187   : > { %v563_v45 = vadd.f32 %v554_v44, %v439_v39  ;;  %v1523_v46 = vpop.f32.mrb[11].mxu1 }
 0x18c   : > { %v673_v47 = vpop.f32.mrb[12].mxu1 }
 0x18d   : > { %v682_v0 = vadd.f32 %v673_v47, %v560_v42  ;;  %v1528_v48 = vpop.f32.mrb[13].mxu1 }
 0x18e   : > { %v676_v49 = vpop.f32.mrb[14].mxu1 }
 0x18f   : > { %v685_v50 = vadd.f32 %v676_v49, %v563_v45  ;;  %v1529_v51 = vpop.f32.mrb[15].mxu1 }
 0x194   : > { %v795_v52 = vpop.f32.mrb[16].mxu1 }
 0x195   : > { %v804_v53 = vadd.f32 %v795_v52, %v682_v0  ;;  %v1534_v54 = vpop.f32.mrb[17].mxu1 }
 0x196   : > { %v798_v55 = vpop.f32.mrb[18].mxu1 }
 0x197   : > { %v807_v56 = vadd.f32 %v798_v55, %v685_v50  ;;  %v1535_v57 = vpop.f32.mrb[19].mxu1 }
 0x19c   : > { %v917_v58 = vpop.f32.mrb[20].mxu1 }
 0x19d   : > { %v926_v59 = vadd.f32 %v917_v58, %v804_v53  ;;  %v1540_v60 = vpop.f32.mrb[21].mxu1 }
 0x19e   : > { %v920_v61 = vpop.f32.mrb[22].mxu1 }
 0x19f   : > { %v929_v62 = vadd.f32 %v920_v61, %v807_v56  ;;  %v1541_v63 = vpop.f32.mrb[23].mxu1 }
 0x1a4   : > { %v1039_v1 = vpop.f32.mrb[24].mxu1 }
 0x1a5   : > { %v1048_v2 = vadd.f32 %v1039_v1, %v926_v59  ;;  %v1546_v3 = vpop.f32.mrb[25].mxu1 }
 0x1a6   : > { %v1042_v4 = vpop.f32.mrb[26].mxu1 }
 0x1a7   : > { %v1051_v5 = vadd.f32 %v1042_v4, %v929_v62  ;;  %v1547_v7 = vpop.f32.mrb[27].mxu1 }
 0x1ac   : > { %v1161_v8 = vpop.f32.mrb[28].mxu1 }
 0x1ad   : > { %v1170_v9 = vadd.f32 %v1161_v8, %v1048_v2  ;;  %v1552_v10 = vpop.f32.mrb[29].mxu1 }
 0x1ae   : > { %v1164_v11 = vpop.f32.mrb[30].mxu1 }
 0x1af   : > { %v1173_v12 = vadd.f32 %v1164_v11, %v1051_v5  ;;  %v1553_v13 = vpop.f32.mrb[31].mxu1 }
 0x1b4   : > { %v1283_v14 = vpop.f32.mrb[32].mxu1 }
 0x1b5   : > { %v1292_v16 = vadd.f32 %v1283_v14, %v1170_v9  ;;  %v1558_v17 = vpop.f32.mrb[33].mxu1 }
 0x1b6   : > { %v1286_v18 = vpop.f32.mrb[34].mxu1 }
 0x1b7   : > { %v1310_v20 = vadd.f32 %v1301_v15, %v1292_v16  ;;  %v1295_v21 = vadd.f32 %v1286_v18, %v1173_v12  ;;  %v1559_v22 = vpop.f32.mrb[35].mxu1 }
 0x1b9   : > { %1316 = vst [vmem:[%s187_s29 + $0x10] sm:$0xff] %v1310_v20  ;;  %v1313_v23 = vadd.f32 %v1306_v19, %v1295_v21 }
 0x1bb   : > { %1319 = vst [vmem:[%s187_s29 + $0x28] sm:$0xff] %v1313_v23 }
 0x1cc   : > { %v1240_v24 = vpop.f32.mrb[0].mxu0 }
 0x1cd   : > { %v1308_v25 = vadd.f32 %v1301_v15, %v1240_v24  ;;  %v1242_v26 = vpop.f32.mrb[1].mxu0 }
 0x1ce   : > { %v1309_v27 = vadd.f32 %v1301_v15, %v1242_v26  ;;  %v1244_v28 = vpop.f32.mrb[2].mxu0 }
 0x1cf   : > { %1314 = vst [vmem:[%s187_s29] sm:$0xff] %v1308_v25  ;;  %v1311_v6 = vadd.f32 %v1306_v19, %v1244_v28  ;;  %v1246_v29 = vpop.f32.mrb[3].mxu0 }
 0x1d0   : > { %1315 = vst [vmem:[%s187_s29 + $0x8] sm:$0xff] %v1309_v27  ;;  %v1312_v30 = vadd.f32 %v1306_v19, %v1246_v29 }
 0x1d1   : > { %1317 = vst [vmem:[%s187_s29 + $0x18] sm:$0xff] %v1311_v6 }
 0x1d2   : > { %1318 = vst [vmem:[%s187_s29 + $0x20] sm:$0xff] %v1312_v30 }
 0x1d3   : > { %1691 = shalt.err (!%p1688_p5)
}
 0x1d4   : > { %s1692_s18 = scalar_lea.hbm %s2017_s15, 768  ;;  %s1696_s23 = scalar_lea.hbm %s2070_s3, 1536 }
 0x1d5   : > { %p1693_p6 = scmp.ne.s32.totalorder %s2017_s15, %s1692_s18  ;;  %p1697_p10 = scmp.lt.u32.totalorder %s2017_s15, %s2070_s3 }
 0x1d6   : > { %p1698_p11 = scmp.lt.u32.totalorder %s1696_s23, %s1692_s18  ;;  %p1700_p13 = scmp.lt.u32.totalorder %s1692_s18, %s2017_s15 }
 0x1d7   : > { %p1694_p7 = pnand %p1693_p6, %p1832_p4 }
 0x1d8   : > { %p1699_p12 = por %p1698_p11, %p1697_p10 }
 0x1d9   : > { %p1695_p9 = pneg %p1694_p7 }
 0x1da   : > { %p1701_p0 = por %p1700_p13, %p1699_p12 }
 0x1dc   : > { %p1702_p1 = pnand %p1701_p0, %p1695_p9 }
 0x1de   : > { %1705 = shalt.err (!%p1702_p1)
}
 0x1df   : > { %s1770_s28 = smov 384   ;;  %s1771_s29 = smov 24  }
 0x1e0   : > { %1594 = dma.vmem_to_hbm [thread:$0]  (%p1832_p4), %s2012_s4, 768, %s2017_s15, %s2021_s7, %s1770_s28, %s1770_s28, %s1771_s29  }
 0x1e1 PF: > { %p1600_p2 = scmp.ge.s32.totalorder %s1756_s17, 2  ;;  %s1351_s30 = sand.u32 1, %s1736_s12  }
 0x1e2   : > { %s1352_s5 = scalar_lea.sflag [#allocation3], %s1351_s30 }
 0x1e3   : > { %p1597_p3 = pnand %p1600_p2, %p1839_p8 }
 0x1e5   : > { %1731 = dma.done.wait (!%p1597_p3), %s1352_s5, 768  }
 0x1e6   : > { %1733 = vsyncadd (!%p1597_p3), %s1352_s5, 4294966528  ;;  %s16_s17 = sadd.s32 1, %s1756_s17   ;;  %s2073_s12 = smov %s1740_s13 }
 0x1e7   : > { %p13_p5 = scmp.ge.s32.totalorder %s16_s17, 4   ;;  %s2074_s13 = smov %s1744_s14 }
 0x1e8   : > { %s2075_s14 = smov %s1845_s25  ;;  %s2076_s15 = smov %s1752_s16 }
 0x1e9   : > { %s2077_s16 = smov %s2079_s20  ;;  %15 = sbr.rel (!%p13_p5) target bundleno = 4 (0x4), region = 75 }
 0x1f0   :  { %1357 = vsyncpa [#allocation3], 1 }
 0x1f1   :  { %1359 = vsyncpa [#allocation3 + $0x1], 1 }

</bundles_post_ra>
